<compile_context>
chip_gen: v5e
topology: v5e:2x2
jax: 0.10.0
libtpu: 0.0.40
codegen_flags: <defaults>
</compile_context>

<pallas_src>
import functools

import jax
import jax.numpy as jnp
from jax import lax
from jax.experimental import pallas as pl
from jax.experimental.pallas import tpu as pltpu


def _round_up(a, b):
    return ((a + b - 1) // b) * b


# ----------------------------- Pallas kernels -----------------------------

def _conv_stats_kernel(p_ref, w_ref, o_ref, sum_ref, ssq_ref, acc_ref):
    # p_ref: (TM, TK) bf16   w_ref: (TK, Cpad) bf16
    # o_ref: (TM, Cpad) f32  sum_ref/ssq_ref: (1, 8, Cpad) f32
    # acc_ref: (TM, Cpad) f32 VMEM scratch, persistent across the K grid axis.
    kk = pl.program_id(1)

    @pl.when(kk == 0)
    def _():
        acc_ref[...] = jnp.zeros_like(acc_ref)

    acc_ref[...] += jnp.dot(p_ref[...], w_ref[...],
                            preferred_element_type=jnp.float32)

    @pl.when(kk == pl.num_programs(1) - 1)
    def _():
        y = acc_ref[...]
        o_ref[...] = y
        # Per-tile BN partial statistics (padded rows are all-zero -> contribute 0).
        s = jnp.sum(y, axis=0, keepdims=True)          # (1, Cpad)
        q = jnp.sum(y * y, axis=0, keepdims=True)      # (1, Cpad)
        sum_ref[...] = jnp.broadcast_to(s[None, :, :], sum_ref.shape)
        ssq_ref[...] = jnp.broadcast_to(q[None, :, :], ssq_ref.shape)


def _bn_relu_kernel(y_ref, scale_ref, shift_ref, o_ref):
    # y_ref: (TM, Cpad) f32; scale/shift: (1, Cpad) f32 broadcast over rows.
    o_ref[...] = jnp.maximum(y_ref[...] * scale_ref[...] + shift_ref[...], 0.0)


# ------------------------------- wrapper ----------------------------------

def _im2col(x_nchw, kernel_size, stride, padding, dilation):
    # Returns patches (N, OH, OW, KH*KW*Cin), channel order (kh, kw, cin).
    n, cin, h, w = x_nchw.shape
    kh = kw = kernel_size
    x_nhwc = jnp.transpose(x_nchw, (0, 2, 3, 1))
    xp = jnp.pad(x_nhwc, ((0, 0), (padding, padding), (padding, padding), (0, 0)))
    oh = (h + 2 * padding - dilation * (kh - 1) - 1) // stride + 1
    ow = (w + 2 * padding - dilation * (kw - 1) - 1) // stride + 1
    cols = []
    for ih in range(kh):
        for iw in range(kw):
            h0 = ih * dilation
            w0 = iw * dilation
            cols.append(xp[:, h0:h0 + oh * stride:stride,
                           w0:w0 + ow * stride:stride, :])
    patches = jnp.concatenate(cols, axis=-1)
    return patches, oh, ow


@functools.partial(jax.jit, static_argnames=("kernel_size", "stride", "padding",
                                             "dilation"))
def basic_conv_forward(x_nchw, weight_oihw, gamma, beta, *,
                       kernel_size, stride=1, padding=0, dilation=1):
    """BasicConv forward: conv2d(no bias) -> BN(batch stats) -> ReLU. NCHW in/out."""
    eps = 1e-5
    n, cin, h, w = x_nchw.shape
    cout = weight_oihw.shape[0]
    kh = kw = kernel_size

    # --- im2col in bf16 (XLA) ---
    patches, oh, ow = _im2col(x_nchw.astype(jnp.bfloat16),
                              kernel_size, stride, padding, dilation)
    m = n * oh * ow
    k = kh * kw * cin

    tm = 256                   # rows per tile; raise to 512-1024 for large M on v6e
    tk = 128                   # K tile (128 suits v5e MXU; 256 also fine on v6e/v7x)
    lane = 128                 # output-channel padding target (lane width)

    m_pad = _round_up(max(m, tm), tm)
    k_pad = _round_up(max(k, tk), tk)
    c_pad = _round_up(max(cout, lane), lane)
    t_m = m_pad // tm
    t_k = k_pad // tk

    p2d = patches.reshape(m, k)
    p2d = jnp.pad(p2d, ((0, m_pad - m), (0, k_pad - k)))          # bf16, zero pad

    # weight (Cout, Cin, KH, KW) -> (KH, KW, Cin, Cout) -> (K, Cout), pad, bf16.
    w2d = jnp.transpose(weight_oihw, (2, 3, 1, 0)).reshape(k, cout)
    w2d = jnp.pad(w2d, ((0, k_pad - k), (0, c_pad - cout))).astype(jnp.bfloat16)

    # --- fused conv matmul + BN partial statistics ---
    conv_out, psum, pssq = pl.pallas_call(
        _conv_stats_kernel,
        out_shape=(
            jax.ShapeDtypeStruct((m_pad, c_pad), jnp.float32),
            jax.ShapeDtypeStruct((t_m, 8, c_pad), jnp.float32),
            jax.ShapeDtypeStruct((t_m, 8, c_pad), jnp.float32),
        ),
        grid=(t_m, t_k),
        in_specs=[
            pl.BlockSpec((tm, tk), lambda i, kk: (i, kk)),
            pl.BlockSpec((tk, c_pad), lambda i, kk: (kk, 0)),
        ],
        out_specs=(
            pl.BlockSpec((tm, c_pad), lambda i, kk: (i, 0)),
            pl.BlockSpec((1, 8, c_pad), lambda i, kk: (i, 0, 0)),
            pl.BlockSpec((1, 8, c_pad), lambda i, kk: (i, 0, 0)),
        ),
        scratch_shapes=[pltpu.VMEM((tm, c_pad), jnp.float32)],
        compiler_params=pltpu.CompilerParams(
            dimension_semantics=("parallel", "arbitrary")),
    )(p2d, w2d)

    # --- finalize BN batch statistics (tiny per-channel reduction in XLA) ---
    total_sum = jnp.sum(psum[:, 0, :], axis=0)                    # (Cpad,)
    total_ssq = jnp.sum(pssq[:, 0, :], axis=0)                    # (Cpad,)
    mean = total_sum / m                                          # true M, pad rows = 0
    var = jnp.maximum(total_ssq / m - mean * mean, 0.0)           # biased (training mode)
    inv = lax.rsqrt(var + eps)
    gamma_p = jnp.pad(gamma.astype(jnp.float32), (0, c_pad - cout))
    beta_p = jnp.pad(beta.astype(jnp.float32), (0, c_pad - cout))
    scale = (gamma_p * inv).reshape(1, c_pad)
    shift = (beta_p - mean * gamma_p * inv).reshape(1, c_pad)

    # --- tiled normalize + ReLU ---
    out2d = pl.pallas_call(
        _bn_relu_kernel,
        out_shape=jax.ShapeDtypeStruct((m_pad, c_pad), jnp.float32),
        grid=(t_m,),
        in_specs=[
            pl.BlockSpec((tm, c_pad), lambda i: (i, 0)),
            pl.BlockSpec((1, c_pad), lambda i: (0, 0)),
            pl.BlockSpec((1, c_pad), lambda i: (0, 0)),
        ],
        out_specs=pl.BlockSpec((tm, c_pad), lambda i: (i, 0)),
        compiler_params=pltpu.CompilerParams(
            dimension_semantics=("parallel",)),
    )(conv_out, scale, shift)

    # (Mpad, Cpad) -> valid (M, Cout) -> (N, OH, OW, Cout) -> NCHW (small, left to XLA).
    out = out2d[:m, :cout].reshape(n, oh, ow, cout)
    return jnp.transpose(out, (0, 3, 1, 2))


# ------------------------------ reference ---------------------------------

def _reference(x_nchw, weight_oihw, gamma, beta, *, stride, padding, dilation):
    # Conv inputs cast to bf16 (matching the kernel's MXU operand precision),
    # f32 accumulation; BN (training-mode batch stats) + ReLU in f32.
    y = lax.conv_general_dilated(
        x_nchw.astype(jnp.bfloat16), weight_oihw.astype(jnp.bfloat16),
        window_strides=(stride, stride),
        padding=((padding, padding), (padding, padding)),
        rhs_dilation=(dilation, dilation),
        dimension_numbers=("NCHW", "OIHW", "NCHW"),
        preferred_element_type=jnp.float32)
    mean = jnp.mean(y, axis=(0, 2, 3), keepdims=True)
    var = jnp.mean((y - mean) ** 2, axis=(0, 2, 3), keepdims=True)
    y = (y - mean) * lax.rsqrt(var + 1e-5)
    y = y * gamma.reshape(1, -1, 1, 1) + beta.reshape(1, -1, 1, 1)
    return jnp.maximum(y, 0.0)


# --------------------------------- main ------------------------------------

if __name__ == "__main__":
    # BasicConv(in_planes=4, out_planes=8, kernel_size=3, stride=1, padding=1)
    N, CIN, H, W = 2, 4, 16, 16
    COUT, KSIZE, STRIDE, PAD, DIL = 8, 3, 1, 1, 1

    key = jax.random.PRNGKey(0)
    kx, kw, kg, kb = jax.random.split(key, 4)
    x = jax.random.normal(kx, (N, CIN, H, W), dtype=jnp.float32)
    weight = jax.random.normal(kw, (COUT, CIN, KSIZE, KSIZE), dtype=jnp.float32) * 0.1
    gamma = 1.0 + 0.1 * jax.random.normal(kg, (COUT,), dtype=jnp.float32)
    beta = 0.1 * jax.random.normal(kb, (COUT,), dtype=jnp.float32)

    out = basic_conv_forward(x, weight, gamma, beta,
                             kernel_size=KSIZE, stride=STRIDE,
                             padding=PAD, dilation=DIL)
    out = jax.block_until_ready(out)

    ref = _reference(x, weight, gamma, beta,
                     stride=STRIDE, padding=PAD, dilation=DIL)
    assert out.shape == (N, COUT, H, W), out.shape
    assert jnp.allclose(out, ref, rtol=2e-3, atol=2e-3), "mismatch vs reference"

    print("KERNEL_OK")
</pallas_src>

<mosaic_0001>
module attributes {stable_mosaic.version = 11 : i64} {
  func.func @_conv_stats_kernel(%arg0: i32, %arg1: i32, %arg2: memref<256x128xbf16, #tpu.memory_space<vmem>>, %arg3: memref<128x128xbf16, #tpu.memory_space<vmem>>, %arg4: memref<256x128xf32, #tpu.memory_space<vmem>>, %arg5: memref<1x8x128xf32, #tpu.memory_space<vmem>>, %arg6: memref<1x8x128xf32, #tpu.memory_space<vmem>>, %arg7: memref<256x128xf32, #tpu.memory_space<vmem>>) attributes {dimension_semantics = [#tpu.dimension_semantics<parallel>, #tpu.dimension_semantics<arbitrary>], iteration_bounds = array<i64: 2, 1>, scalar_prefetch = 0 : i64, scratch_operands = 1 : i64, tpu.core_type = #tpu.core_type<tc>, window_params = [{transform_indices = @transform_0, window_bounds = array<i64: 256, 128>}, {transform_indices = @transform_1, window_bounds = array<i64: 128, 128>}, {transform_indices = @transform_2, window_bounds = array<i64: 256, 128>}, {transform_indices = @transform_3, window_bounds = array<i64: 1, 8, 128>}, {transform_indices = @transform_4, window_bounds = array<i64: 1, 8, 128>}]} {
    %c0_i32 = arith.constant 0 : i32
    %0 = arith.cmpi eq, %arg1, %c0_i32 : i32
    %1 = arith.extui %0 : i1 to i32
    %c0_i32_0 = arith.constant 0 : i32
    %2 = arith.cmpi ne, %1, %c0_i32_0 : i32
    scf.if %2 {
      %cst_10 = arith.constant 0.000000e+00 : f32
      %12 = vector.broadcast %cst_10 : f32 to vector<256x128xf32>
      %c0_11 = arith.constant 0 : index
      %c0_12 = arith.constant 0 : index
      %13 = vector.load %arg7[%c0_11, %c0_12] : memref<256x128xf32, #tpu.memory_space<vmem>>, vector<256x128xf32>
      tpu.vector_store %arg7[%c0_11, %c0_12], %12 {strides = array<i32>} : memref<256x128xf32, #tpu.memory_space<vmem>>, vector<256x128xf32>,
    } else {
    }
    %c0 = arith.constant 0 : index
    %c0_1 = arith.constant 0 : index
    %3 = vector.load %arg7[%c0, %c0_1] : memref<256x128xf32, #tpu.memory_space<vmem>>, vector<256x128xf32>
    %c0_2 = arith.constant 0 : index
    %c0_3 = arith.constant 0 : index
    %4 = vector.load %arg2[%c0_2, %c0_3] : memref<256x128xbf16, #tpu.memory_space<vmem>>, vector<256x128xbf16>
    %c0_4 = arith.constant 0 : index
    %c0_5 = arith.constant 0 : index
    %5 = vector.load %arg3[%c0_4, %c0_5] : memref<128x128xbf16, #tpu.memory_space<vmem>>, vector<128x128xbf16>
    %cst = arith.constant dense<0.000000e+00> : vector<256x128xf32>
    %6 = tpu.matmul %4, %5, %cst {dimension_numbers = #tpu.dot_dimension_numbers<[1], [0], [0], [1], [0, 0, 1, 1], [], []>} : vector<256x128xbf16>, vector<128x128xbf16>, vector<256x128xf32> -> vector<256x128xf32>
    %7 = arith.addf %3, %6 : vector<256x128xf32>
    %c0_6 = arith.constant 0 : index
    %c0_7 = arith.constant 0 : index
    %8 = vector.load %arg7[%c0_6, %c0_7] : memref<256x128xf32, #tpu.memory_space<vmem>>, vector<256x128xf32>
    tpu.vector_store %arg7[%c0_6, %c0_7], %7 {strides = array<i32>} : memref<256x128xf32, #tpu.memory_space<vmem>>, vector<256x128xf32>,
    %c0_i32_8 = arith.constant 0 : i32
    %9 = arith.cmpi eq, %arg1, %c0_i32_8 : i32
    %10 = arith.extui %9 : i1 to i32
    %c0_i32_9 = arith.constant 0 : i32
    %11 = arith.cmpi ne, %10, %c0_i32_9 : i32
    scf.if %11 {
      %c0_10 = arith.constant 0 : index
      %c0_11 = arith.constant 0 : index
      %12 = vector.load %arg7[%c0_10, %c0_11] : memref<256x128xf32, #tpu.memory_space<vmem>>, vector<256x128xf32>
      %c0_12 = arith.constant 0 : index
      %c0_13 = arith.constant 0 : index
      %13 = vector.load %arg4[%c0_12, %c0_13] : memref<256x128xf32, #tpu.memory_space<vmem>>, vector<256x128xf32>
      tpu.vector_store %arg4[%c0_12, %c0_13], %12 {strides = array<i32>} : memref<256x128xf32, #tpu.memory_space<vmem>>, vector<256x128xf32>,
      %cst_14 = arith.constant dense<0.000000e+00> : vector<128xf32>
      %14 = vector.multi_reduction <add>, %12, %cst_14 [0] : vector<256x128xf32> to vector<128xf32>
      %15 = vector.shape_cast %14 : vector<128xf32> to vector<1x128xf32>
      %16 = arith.mulf %12, %12 : vector<256x128xf32>
      %cst_15 = arith.constant dense<0.000000e+00> : vector<128xf32>
      %17 = vector.multi_reduction <add>, %16, %cst_15 [0] : vector<256x128xf32> to vector<128xf32>
      %18 = vector.shape_cast %17 : vector<128xf32> to vector<1x128xf32>
      %19 = vector.shape_cast %15 : vector<1x128xf32> to vector<1x1x128xf32>
      %20 = vector.shape_cast %19 : vector<1x1x128xf32> to vector<1x1x128xf32>
      %21 = vector.broadcast %20 : vector<1x1x128xf32> to vector<1x8x128xf32>
      %c0_16 = arith.constant 0 : index
      %c0_17 = arith.constant 0 : index
      %c0_18 = arith.constant 0 : index
      %22 = vector.load %arg5[%c0_16, %c0_17, %c0_18] : memref<1x8x128xf32, #tpu.memory_space<vmem>>, vector<1x8x128xf32>
      tpu.vector_store %arg5[%c0_16, %c0_17, %c0_18], %21 {strides = array<i32>} : memref<1x8x128xf32, #tpu.memory_space<vmem>>, vector<1x8x128xf32>,
      %23 = vector.shape_cast %18 : vector<1x128xf32> to vector<1x1x128xf32>
      %24 = vector.shape_cast %23 : vector<1x1x128xf32> to vector<1x1x128xf32>
      %25 = vector.broadcast %24 : vector<1x1x128xf32> to vector<1x8x128xf32>
      %c0_19 = arith.constant 0 : index
      %c0_20 = arith.constant 0 : index
      %c0_21 = arith.constant 0 : index
      %26 = vector.load %arg6[%c0_19, %c0_20, %c0_21] : memref<1x8x128xf32, #tpu.memory_space<vmem>>, vector<1x8x128xf32>
      tpu.vector_store %arg6[%c0_19, %c0_20, %c0_21], %25 {strides = array<i32>} : memref<1x8x128xf32, #tpu.memory_space<vmem>>, vector<1x8x128xf32>,
    } else {
    }
    return
  }
  func.func @transform_0(%arg0: i32, %arg1: i32) -> (i32, i32) {
    %c0_i32 = arith.constant 0 : i32
    return %arg0, %arg1 : i32, i32
  }
  func.func @transform_1(%arg0: i32, %arg1: i32) -> (i32, i32) {
    %c0_i32 = arith.constant 0 : i32
    %c0_i32_0 = arith.constant 0 : i32
    return %arg1, %c0_i32 : i32, i32
  }
  func.func @transform_2(%arg0: i32, %arg1: i32) -> (i32, i32) {
    %c0_i32 = arith.constant 0 : i32
    %c0_i32_0 = arith.constant 0 : i32
    return %arg0, %c0_i32 : i32, i32
  }
  func.func @transform_3(%arg0: i32, %arg1: i32) -> (i32, i32, i32) {
    %c0_i32 = arith.constant 0 : i32
    %c0_i32_0 = arith.constant 0 : i32
    %c0_i32_1 = arith.constant 0 : i32
    return %arg0, %c0_i32, %c0_i32_0 : i32, i32, i32
  }
  func.func @transform_4(%arg0: i32, %arg1: i32) -> (i32, i32, i32) {
    %c0_i32 = arith.constant 0 : i32
    %c0_i32_0 = arith.constant 0 : i32
    %c0_i32_1 = arith.constant 0 : i32
    return %arg0, %c0_i32, %c0_i32_0 : i32, i32, i32
  }
}

module attributes {stable_mosaic.version = 11 : i64} {
  func.func @_bn_relu_kernel(%arg0: i32, %arg1: memref<256x128xf32, #tpu.memory_space<vmem>>, %arg2: memref<1x128xf32, #tpu.memory_space<vmem>>, %arg3: memref<1x128xf32, #tpu.memory_space<vmem>>, %arg4: memref<256x128xf32, #tpu.memory_space<vmem>>) attributes {dimension_semantics = [#tpu.dimension_semantics<parallel>], iteration_bounds = array<i64: 2>, scalar_prefetch = 0 : i64, scratch_operands = 0 : i64, tpu.core_type = #tpu.core_type<tc>, window_params = [{transform_indices = @transform_0, window_bounds = array<i64: 256, 128>}, {pipeline_mode = #tpu.pipeline_mode<synchronous>, transform_indices = @transform_1, window_bounds = array<i64: 1, 128>}, {pipeline_mode = #tpu.pipeline_mode<synchronous>, transform_indices = @transform_2, window_bounds = array<i64: 1, 128>}, {transform_indices = @transform_3, window_bounds = array<i64: 256, 128>}]} {
    %c0 = arith.constant 0 : index
    %c0_0 = arith.constant 0 : index
    %0 = vector.load %arg1[%c0, %c0_0] : memref<256x128xf32, #tpu.memory_space<vmem>>, vector<256x128xf32>
    %c0_1 = arith.constant 0 : index
    %c0_2 = arith.constant 0 : index
    %1 = vector.load %arg2[%c0_1, %c0_2] : memref<1x128xf32, #tpu.memory_space<vmem>>, vector<1x128xf32>
    %2 = vector.broadcast %1 : vector<1x128xf32> to vector<256x128xf32>
    %3 = arith.mulf %0, %2 : vector<256x128xf32>
    %c0_3 = arith.constant 0 : index
    %c0_4 = arith.constant 0 : index
    %4 = vector.load %arg3[%c0_3, %c0_4] : memref<1x128xf32, #tpu.memory_space<vmem>>, vector<1x128xf32>
    %5 = vector.broadcast %4 : vector<1x128xf32> to vector<256x128xf32>
    %6 = arith.addf %3, %5 : vector<256x128xf32>
    %cst = arith.constant 0.000000e+00 : f32
    %7 = vector.broadcast %cst : f32 to vector<256x128xf32>
    %8 = arith.maximumf %6, %7 : vector<256x128xf32>
    %c0_5 = arith.constant 0 : index
    %c0_6 = arith.constant 0 : index
    %9 = vector.load %arg4[%c0_5, %c0_6] : memref<256x128xf32, #tpu.memory_space<vmem>>, vector<256x128xf32>
    tpu.vector_store %arg4[%c0_5, %c0_6], %8 {strides = array<i32>} : memref<256x128xf32, #tpu.memory_space<vmem>>, vector<256x128xf32>,
    return
  }
  func.func @transform_0(%arg0: i32) -> (i32, i32) {
    %c0_i32 = arith.constant 0 : i32
    %c0_i32_0 = arith.constant 0 : i32
    return %arg0, %c0_i32 : i32, i32
  }
  func.func @transform_1(%arg0: i32) -> (i32, i32) {
    %c0_i32 = arith.constant 0 : i32
    %c0_i32_0 = arith.constant 0 : i32
    %c0_i32_1 = arith.constant 0 : i32
    return %c0_i32, %c0_i32_0 : i32, i32
  }
  func.func @transform_2(%arg0: i32) -> (i32, i32) {
    %c0_i32 = arith.constant 0 : i32
    %c0_i32_0 = arith.constant 0 : i32
    %c0_i32_1 = arith.constant 0 : i32
    return %c0_i32, %c0_i32_0 : i32, i32
  }
  func.func @transform_3(%arg0: i32) -> (i32, i32) {
    %c0_i32 = arith.constant 0 : i32
    %c0_i32_0 = arith.constant 0 : i32
    return %arg0, %c0_i32 : i32, i32
  }
}

</mosaic_0001>

<bundles_post_ra>
// kernel: basic_conv_forward.3
= control target key start
LH: loop header
LB: loop body
LE: loop exit
PB: predicated region body
PF: predicated region fallthrough
CT: control target
= control target key end

     0   :  { %s447_s12 = smov 0   ;;  %s606_s0 = inlined_call_operand.vmem [shape: f32[512,128], index: 0, kind: input, shape index: {}]   ;;  %s607_s1 = inlined_call_operand.vmem [shape: f32[1,128], index: 1, kind: input, shape index: {}]   ;;  %s608_s2 = inlined_call_operand.vmem [shape: f32[1,128], index: 2, kind: input, shape index: {}]   ;;  %s609_s3 = inlined_call_operand.vmem [shape: f32[512,128], index: 3, kind: output, shape index: {}]  }
   0x1 LB: > { %s398_s13 = sadd.s32 4294967295, %s425_s12   ;;  %p402_p0 = scmp.ge.s32.totalorder %s425_s12, 1  ;;  %s425_s12 = sphi %s447_s12, %s13_s12  }
   0x2   : > { %p138_p1 = scmp.lt.s32.totalorder %s425_s12, 3 }
   0x4   : > { %p139_p2 = pnand %p402_p0, %p138_p1 }
   0x5   : > { %s403_s14 = sshll.u32 (!%p139_p2), %s398_s13, 5 }
   0x6   : > { %142 = sbr.rel (%p139_p2) target bundleno = 53 (0x35), region = 32  ;;  %p163_p3 = scmp.lt.s32.totalorder (!%p139_p2), %s403_s14, 63 }
   0xb   : > { %s611_s14 = smov (!%p163_p3, %s403_s14), 63  ;;  %v458_v0 = vld [vmem:[%s607_s1] ss:$0 sm:$0xff] }
   0xc   : > { %s404_s17 = sshll.u32 %s611_s14, 3  ;;  %v468_v1 = vld [vmem:[%s608_s2] ss:$0 sm:$0xff] }
   0xd   : > { %s463_s20 = scalar_lea.vmem %s606_s0, %s404_s17  ;;  %s491_s25 = scalar_lea.vmem %s609_s3, %s404_s17 }
   0xe   : > { %v174_v2 = vld [vmem:[%s463_s20] sm:$0xff]  ;;  %v175_v3 = vld [vmem:[%s463_s20 + $0x8] sm:$0xff]  ;;  %v176_v4 = vld [vmem:[%s463_s20 + $0x10] sm:$0xff] }
   0xf   : > { %v210_v5 = vmul.f32 %v458_v0, %v174_v2  ;;  %v211_v6 = vmul.f32 %v458_v0, %v175_v3  ;;  %v212_v7 = vmul.f32 %v458_v0, %v176_v4  ;;  %v177_v8 = vld [vmem:[%s463_s20 + $0x18] sm:$0xff]  ;;  %v178_v9 = vld [vmem:[%s463_s20 + $0x20] sm:$0xff]  ;;  %v179_v10 = vld [vmem:[%s463_s20 + $0x28] sm:$0xff] }
  0x10   : > { %v213_v11 = vmul.f32 %v458_v0, %v177_v8  ;;  %v214_v12 = vmul.f32 %v458_v0, %v178_v9  ;;  %v215_v13 = vmul.f32 %v458_v0, %v179_v10  ;;  %v180_v14 = vld [vmem:[%s463_s20 + $0x30] sm:$0xff]  ;;  %v181_v15 = vld [vmem:[%s463_s20 + $0x38] sm:$0xff]  ;;  %v182_v24 = vld [vmem:[%s463_s20 + $0x40] sm:$0xff] }
  0x11   : > { %v246_v16 = vadd.f32 %v468_v1, %v210_v5  ;;  %v247_v17 = vadd.f32 %v468_v1, %v211_v6  ;;  %v248_v18 = vadd.f32 %v468_v1, %v212_v7  ;;  %v216_v19 = vmul.f32 %v458_v0, %v180_v14  ;;  %v183_v25 = vld [vmem:[%s463_s20 + $0x48] sm:$0xff]  ;;  %v184_v26 = vld [vmem:[%s463_s20 + $0x50] sm:$0xff]  ;;  %v185_v31 = vld [vmem:[%s463_s20 + $0x58] sm:$0xff] }
  0x12   : > { %v249_v20 = vadd.f32 %v468_v1, %v213_v11  ;;  %v250_v21 = vadd.f32 %v468_v1, %v214_v12  ;;  %v251_v22 = vadd.f32 %v468_v1, %v215_v13  ;;  %v217_v23 = vmul.f32 %v458_v0, %v181_v15  ;;  %v186_v32 = vld [vmem:[%s463_s20 + $0x60] sm:$0xff]  ;;  %v187_v33 = vld [vmem:[%s463_s20 + $0x68] sm:$0xff]  ;;  %v188_v37 = vld [vmem:[%s463_s20 + $0x70] sm:$0xff] }
  0x13   : > { %v278_v27 = vmax.f32 %v246_v16, 0.0  ;;  %v279_v28 = vmax.f32 %v247_v17, 0.0  ;;  %v280_v29 = vmax.f32 %v248_v18, 0.0  ;;  %v252_v30 = vadd.f32 %v468_v1, %v216_v19  ;;  %v189_v42 = vld [vmem:[%s463_s20 + $0x78] sm:$0xff]  ;;  %v190_v54 = vld [vmem:[%s463_s20 + $0x80] sm:$0xff]  ;;  %v191_v55 = vld [vmem:[%s463_s20 + $0x88] sm:$0xff] }
  0x14   : > { %v281_v34 = vmax.f32 %v249_v20, 0.0  ;;  %v282_v35 = vmax.f32 %v250_v21, 0.0  ;;  %v253_v36 = vadd.f32 %v468_v1, %v217_v23  ;;  %v283_v38 = vmax.f32 %v251_v22, 0.0  ;;  %v192_v56 = vld [vmem:[%s463_s20 + $0x90] sm:$0xff]  ;;  %v193_v59 = vld [vmem:[%s463_s20 + $0x98] sm:$0xff]  ;;  %v194_v63 = vld [vmem:[%s463_s20 + $0xa0] sm:$0xff] }
  0x15   : > { %310 = vst [vmem:[%s491_s25] sm:$0xff] %v278_v27  ;;  %v218_v39 = vmul.f32 %v458_v0, %v182_v24  ;;  %v219_v40 = vmul.f32 %v458_v0, %v183_v25  ;;  %v220_v41 = vmul.f32 %v458_v0, %v184_v26  ;;  %v284_v43 = vmax.f32 %v252_v30, 0.0  ;;  %v195_v6 = vld [vmem:[%s463_s20 + $0xa8] sm:$0xff]  ;;  %v196_v10 = vld [vmem:[%s463_s20 + $0xb0] sm:$0xff]  ;;  %v197_v14 = vld [vmem:[%s463_s20 + $0xb8] sm:$0xff] }
  0x16   : > { %311 = vst [vmem:[%s491_s25 + $0x8] sm:$0xff] %v279_v28  ;;  %v221_v44 = vmul.f32 %v458_v0, %v185_v31  ;;  %v222_v45 = vmul.f32 %v458_v0, %v186_v32  ;;  %v223_v46 = vmul.f32 %v458_v0, %v187_v33  ;;  %v224_v50 = vmul.f32 %v458_v0, %v188_v37  ;;  %v198_v18 = vld [vmem:[%s463_s20 + $0xc0] sm:$0xff]  ;;  %v199_v22 = vld [vmem:[%s463_s20 + $0xc8] sm:$0xff]  ;;  %v200_v26 = vld [vmem:[%s463_s20 + $0xd0] sm:$0xff] }
  0x17   : > { %312 = vst [vmem:[%s491_s25 + $0x10] sm:$0xff] %v280_v29  ;;  %v254_v47 = vadd.f32 %v468_v1, %v218_v39  ;;  %v255_v48 = vadd.f32 %v468_v1, %v219_v40  ;;  %v256_v49 = vadd.f32 %v468_v1, %v220_v41  ;;  %v285_v51 = vmax.f32 %v253_v36, 0.0  ;;  %v201_v30 = vld [vmem:[%s463_s20 + $0xd8] sm:$0xff] }
  0x18   : > { %313 = vst [vmem:[%s491_s25 + $0x18] sm:$0xff] %v281_v34  ;;  %v257_v52 = vadd.f32 %v468_v1, %v221_v44  ;;  %v225_v53 = vmul.f32 %v458_v0, %v189_v42  ;;  %v258_v58 = vadd.f32 %v468_v1, %v222_v45  ;;  %v259_v62 = vadd.f32 %v468_v1, %v223_v46  ;;  %v202_v34 = vld [vmem:[%s463_s20 + $0xe0] sm:$0xff]  ;;  %v204_v42 = vld [vmem:[%s463_s20 + $0xf0] sm:$0xff]  ;;  %v205_v46 = vld [vmem:[%s463_s20 + $0xf8] sm:$0xff] }
  0x19   : > { %314 = vst [vmem:[%s491_s25 + $0x20] sm:$0xff] %v282_v35  ;;  %v286_v57 = vmax.f32 %v254_v47, 0.0  ;;  %v287_v60 = vmax.f32 %v255_v48, 0.0  ;;  %v288_v61 = vmax.f32 %v256_v49, 0.0  ;;  %v260_v2 = vadd.f32 %v468_v1, %v224_v50 }
  0x1a   : > { %315 = vst [vmem:[%s491_s25 + $0x28] sm:$0xff] %v283_v38  ;;  %v226_v3 = vmul.f32 %v458_v0, %v190_v54  ;;  %v227_v4 = vmul.f32 %v458_v0, %v191_v55  ;;  %v228_v5 = vmul.f32 %v458_v0, %v192_v56  ;;  %v289_v7 = vmax.f32 %v257_v52, 0.0  ;;  %v203_v38 = vld [vmem:[%s463_s20 + $0xe8] sm:$0xff] }
  0x1b   : > { %316 = vst [vmem:[%s491_s25 + $0x30] sm:$0xff] %v284_v43  ;;  %v261_v8 = vadd.f32 %v468_v1, %v225_v53  ;;  %v229_v9 = vmul.f32 %v458_v0, %v193_v59  ;;  %v290_v11 = vmax.f32 %v258_v58, 0.0  ;;  %v230_v13 = vmul.f32 %v458_v0, %v194_v63 }
  0x1c   : > { %317 = vst [vmem:[%s491_s25 + $0x38] sm:$0xff] %v285_v51  ;;  %v262_v12 = vadd.f32 %v468_v1, %v226_v3  ;;  %v291_v15 = vmax.f32 %v259_v62, 0.0  ;;  %v263_v16 = vadd.f32 %v468_v1, %v227_v4  ;;  %v231_v17 = vmul.f32 %v458_v0, %v195_v6 }
  0x1d   : > { %318 = vst [vmem:[%s491_s25 + $0x40] sm:$0xff] %v286_v57  ;;  %v292_v19 = vmax.f32 %v260_v2, 0.0  ;;  %v264_v20 = vadd.f32 %v468_v1, %v228_v5  ;;  %v232_v21 = vmul.f32 %v458_v0, %v196_v10  ;;  %v293_v23 = vmax.f32 %v261_v8, 0.0 }
  0x1e   : > { %319 = vst [vmem:[%s491_s25 + $0x48] sm:$0xff] %v287_v60  ;;  %v265_v24 = vadd.f32 %v468_v1, %v229_v9  ;;  %v233_v25 = vmul.f32 %v458_v0, %v197_v14  ;;  %v294_v27 = vmax.f32 %v262_v12, 0.0  ;;  %v266_v28 = vadd.f32 %v468_v1, %v230_v13 }
  0x1f   : > { %320 = vst [vmem:[%s491_s25 + $0x50] sm:$0xff] %v288_v61  ;;  %v234_v29 = vmul.f32 %v458_v0, %v198_v18  ;;  %v295_v31 = vmax.f32 %v263_v16, 0.0  ;;  %v267_v32 = vadd.f32 %v468_v1, %v231_v17  ;;  %v235_v33 = vmul.f32 %v458_v0, %v199_v22 }
  0x20   : > { %321 = vst [vmem:[%s491_s25 + $0x58] sm:$0xff] %v289_v7  ;;  %v296_v35 = vmax.f32 %v264_v20, 0.0  ;;  %v268_v36 = vadd.f32 %v468_v1, %v232_v21  ;;  %v236_v37 = vmul.f32 %v458_v0, %v200_v26  ;;  %v297_v39 = vmax.f32 %v265_v24, 0.0 }
  0x21   : > { %322 = vst [vmem:[%s491_s25 + $0x60] sm:$0xff] %v290_v11  ;;  %v269_v40 = vadd.f32 %v468_v1, %v233_v25  ;;  %v237_v41 = vmul.f32 %v458_v0, %v201_v30  ;;  %v298_v43 = vmax.f32 %v266_v28, 0.0  ;;  %v270_v44 = vadd.f32 %v468_v1, %v234_v29 }
  0x22   : > { %323 = vst [vmem:[%s491_s25 + $0x68] sm:$0xff] %v291_v15  ;;  %v238_v45 = vmul.f32 %v458_v0, %v202_v34  ;;  %v299_v47 = vmax.f32 %v267_v32, 0.0  ;;  %v271_v48 = vadd.f32 %v468_v1, %v235_v33  ;;  %v239_v49 = vmul.f32 %v458_v0, %v203_v38 }
  0x23   : > { %324 = vst [vmem:[%s491_s25 + $0x70] sm:$0xff] %v292_v19  ;;  %v300_v50 = vmax.f32 %v268_v36, 0.0  ;;  %v272_v51 = vadd.f32 %v468_v1, %v236_v37  ;;  %v240_v52 = vmul.f32 %v458_v0, %v204_v42  ;;  %v301_v53 = vmax.f32 %v269_v40, 0.0 }
  0x24   : > { %325 = vst [vmem:[%s491_s25 + $0x78] sm:$0xff] %v293_v23  ;;  %v273_v54 = vadd.f32 %v468_v1, %v237_v41  ;;  %v241_v55 = vmul.f32 %v458_v0, %v205_v46  ;;  %v302_v56 = vmax.f32 %v270_v44, 0.0  ;;  %v274_v57 = vadd.f32 %v468_v1, %v238_v45 }
  0x25   : > { %326 = vst [vmem:[%s491_s25 + $0x80] sm:$0xff] %v294_v27  ;;  %v303_v58 = vmax.f32 %v271_v48, 0.0  ;;  %v275_v59 = vadd.f32 %v468_v1, %v239_v49  ;;  %v304_v60 = vmax.f32 %v272_v51, 0.0  ;;  %v276_v61 = vadd.f32 %v468_v1, %v240_v52 }
  0x26   : > { %327 = vst [vmem:[%s491_s25 + $0x88] sm:$0xff] %v295_v31  ;;  %v305_v0 = vmax.f32 %v273_v54, 0.0  ;;  %v277_v62 = vadd.f32 %v468_v1, %v241_v55  ;;  %v306_v63 = vmax.f32 %v274_v57, 0.0 }
  0x27   : > { %328 = vst [vmem:[%s491_s25 + $0x90] sm:$0xff] %v296_v35  ;;  %v307_v2 = vmax.f32 %v275_v59, 0.0  ;;  %v308_v3 = vmax.f32 %v276_v61, 0.0 }
  0x28   : > { %329 = vst [vmem:[%s491_s25 + $0x98] sm:$0xff] %v297_v39  ;;  %v309_v4 = vmax.f32 %v277_v62, 0.0 }
  0x29   : > { %330 = vst [vmem:[%s491_s25 + $0xa0] sm:$0xff] %v298_v43 }
  0x2a   : > { %331 = vst [vmem:[%s491_s25 + $0xa8] sm:$0xff] %v299_v47 }
  0x2b   : > { %332 = vst [vmem:[%s491_s25 + $0xb0] sm:$0xff] %v300_v50 }
  0x2c   : > { %333 = vst [vmem:[%s491_s25 + $0xb8] sm:$0xff] %v301_v53 }
  0x2d   : > { %334 = vst [vmem:[%s491_s25 + $0xc0] sm:$0xff] %v302_v56 }
  0x2e   : > { %335 = vst [vmem:[%s491_s25 + $0xc8] sm:$0xff] %v303_v58 }
  0x2f   : > { %336 = vst [vmem:[%s491_s25 + $0xd0] sm:$0xff] %v304_v60 }
  0x30   : > { %337 = vst [vmem:[%s491_s25 + $0xd8] sm:$0xff] %v305_v0 }
  0x31   : > { %338 = vst [vmem:[%s491_s25 + $0xe0] sm:$0xff] %v306_v63 }
  0x32   : > { %339 = vst [vmem:[%s491_s25 + $0xe8] sm:$0xff] %v307_v2 }
  0x33   : > { %340 = vst [vmem:[%s491_s25 + $0xf0] sm:$0xff] %v308_v3 }
  0x34   : > { %341 = vst [vmem:[%s491_s25 + $0xf8] sm:$0xff] %v309_v4 }
  0x35 PF: > { %s13_s12 = sadd.s32 1, %s425_s12  }
  0x36   : > { %p10_p4 = scmp.ge.s32.totalorder %s13_s12, 4  }
  0x38   :  { %12 = sbr.rel (!%p10_p4) target bundleno = 1 (0x1), region = 62 }

// kernel: basic_conv_forward.2
= control target key start
LH: loop header
LB: loop body
LE: loop exit
PB: predicated region body
PF: predicated region fallthrough
CT: control target
= control target key end

     0   :  { %s1231_s15 = smov 0   ;;  %s1233_s16 = smov 0   ;;  %s1469_s0 = inlined_call_operand.vmem [shape: bf16[512,128], index: 0, kind: input, shape index: {}]   ;;  %s1470_s1 = inlined_call_operand.vmem [shape: bf16[128,128], index: 1, kind: input, shape index: {}]   ;;  %s1471_s2 = inlined_call_operand.vmem [shape: f32[512,128], index: 2, kind: output, shape index: {0}]   ;;  %s1472_s3 = inlined_call_operand.vmem [shape: f32[2,8,128], index: 3, kind: output, shape index: {1}]   ;;  %s1473_s4 = inlined_call_operand.vmem [shape: f32[2,8,128], index: 4, kind: output, shape index: {2}]  }
   0x1   :  { %s1235_s17 = smov 0  }
   0x2 LB: > { %s27_s18 = sadd.s32 1, %s1200_s16  ;;  %p1005_p0 = scmp.ge.s32.totalorder %s1204_s17, 1  ;;  %s1204_s17 = sphi %s1235_s17, %s15_s17   ;;  %s1200_s16 = sphi %s1233_s16, %s1475_s16   ;;  %s1196_s15 = sphi %s1231_s15, %s1474_s15  }
   0x3   : > { %p29_p1 = scmp.ge.s32.totalorder %s27_s18, 2  ;;  %p196_p2 = scmp.lt.s32.totalorder %s1204_s17, 3 }
   0x5   : > { %s1477_s18 = smov (%p29_p1, %s27_s18), 0  ;;  %p197_p3 = pnand %p1005_p0, %p196_p2 }
   0x6   : > { %s1006_s27 = sshll.u32 (!%p197_p3), %s1196_s15, 5  ;;  %p259_p5 = scmp.lt.s32.totalorder (!%p197_p3), %s1196_s15, 1 }
   0x7   : > { %200 = sbr.rel (%p197_p3) target bundleno = 291 (0x123), region = 28  ;;  %p239_p4 = scmp.lt.s32.totalorder (!%p197_p3), %s1006_s27, 63 }
   0xc   : > { %v1133_v0 = vld [vmem:[%s1470_s1 + $0x38] sm:$0xff]  ;;  %v1132_v1 = vld [vmem:[%s1470_s1 + $0x30] sm:$0xff]  ;;  %v1131_v2 = vld [vmem:[%s1470_s1 + $0x28] sm:$0xff]  ;;  %s1479_s27 = smov (!%p239_p4, %s1006_s27), 63  ;;  %s1481_s15 = smov (!%p259_p5, %s1196_s15), 1 }
   0xd   : > { %527 = vmatpush.bf16.msra.mxu0 %v1133_v0  ;;  %1134 = vmatpush.bf16.msra.mxu1 %v1133_v0  ;;  %v1130_v3 = vld [vmem:[%s1470_s1 + $0x20] sm:$0xff]  ;;  %v1129_v4 = vld [vmem:[%s1470_s1 + $0x18] sm:$0xff]  ;;  %v1128_v5 = vld [vmem:[%s1470_s1 + $0x10] sm:$0xff]  ;;  %s1007_s8 = sshll.u32 %s1479_s27, 2  ;;  %s1009_s14 = sshll.u32 %s1479_s27, 3 }
   0xe   : > { %1135 = vmatpush.bf16.msra.mxu2 %v1133_v0  ;;  %1136 = vmatpush.bf16.msra.mxu3 %v1133_v0  ;;  %v1127_v6 = vld [vmem:[%s1470_s1 + $0x8] sm:$0xff]  ;;  %v1126_v7 = vld [vmem:[%s1470_s1] sm:$0xff]  ;;  %s1282_s13 = scalar_lea.vmem %s1469_s0, %s1007_s8  ;;  %s1304_s21 = scalar_lea.vmem %s1471_s2, %s1009_s14 }
   0xf   : > { %v1110_v8 = vld [vmem:[%s1282_s13] sm:$0xff]  ;;  %v1111_v12 = vld [vmem:[%s1282_s13 + $0x8] sm:$0xff]  ;;  %v1112_v16 = vld [vmem:[%s1282_s13 + $0x10] sm:$0xff]  ;;  %s1010_s22 = sshll.u32 %s1481_s15, 3 }
  0x10   : > { %v1114_v9 = vld [vmem:[%s1282_s13 + $0x20] sm:$0xff]  ;;  %v1115_v13 = vld [vmem:[%s1282_s13 + $0x28] sm:$0xff]  ;;  %v1116_v17 = vld [vmem:[%s1282_s13 + $0x30] sm:$0xff]  ;;  %s262_s25 = scalar_lea.vmem %s1472_s3, %s1010_s22  ;;  %s266_s28 = scalar_lea.vmem %s1473_s4, %s1010_s22 }
  0x11   : > { %528 = vmatpush.bf16.msra.mxu0 %v1132_v1  ;;  %1137 = vmatpush.bf16.msra.mxu1 %v1132_v1  ;;  %v1118_v10 = vld [vmem:[%s1282_s13 + $0x40] sm:$0xff]  ;;  %v1119_v14 = vld [vmem:[%s1282_s13 + $0x48] sm:$0xff]  ;;  %v1120_v18 = vld [vmem:[%s1282_s13 + $0x50] sm:$0xff] }
  0x12   : > { %1138 = vmatpush.bf16.msra.mxu2 %v1132_v1  ;;  %1139 = vmatpush.bf16.msra.mxu3 %v1132_v1  ;;  %v1122_v11 = vld [vmem:[%s1282_s13 + $0x60] sm:$0xff]  ;;  %v1123_v15 = vld [vmem:[%s1282_s13 + $0x68] sm:$0xff]  ;;  %v1124_v19 = vld [vmem:[%s1282_s13 + $0x70] sm:$0xff] }
  0x13   : > { %v1113_v20 = vld [vmem:[%s1282_s13 + $0x18] sm:$0xff] }
  0x14   : > { %v1117_v21 = vld [vmem:[%s1282_s13 + $0x38] sm:$0xff] }
  0x15   : > { %529 = vmatpush.bf16.msra.mxu0 %v1131_v2  ;;  %1140 = vmatpush.bf16.msra.mxu1 %v1131_v2  ;;  %v1121_v22 = vld [vmem:[%s1282_s13 + $0x58] sm:$0xff] }
  0x16   : > { %1141 = vmatpush.bf16.msra.mxu2 %v1131_v2  ;;  %1142 = vmatpush.bf16.msra.mxu3 %v1131_v2  ;;  %v1125_v23 = vld [vmem:[%s1282_s13 + $0x78] sm:$0xff] }
  0x19   : > { %530 = vmatpush.bf16.msra.mxu0 %v1130_v3  ;;  %1143 = vmatpush.bf16.msra.mxu1 %v1130_v3 }
  0x1a   : > { %1144 = vmatpush.bf16.msra.mxu2 %v1130_v3  ;;  %1145 = vmatpush.bf16.msra.mxu3 %v1130_v3 }
  0x1d   : > { %531 = vmatpush.bf16.msra.mxu0 %v1129_v4  ;;  %1146 = vmatpush.bf16.msra.mxu1 %v1129_v4 }
  0x1e   : > { %1147 = vmatpush.bf16.msra.mxu2 %v1129_v4  ;;  %1148 = vmatpush.bf16.msra.mxu3 %v1129_v4 }
  0x21   : > { %532 = vmatpush.bf16.msra.mxu0 %v1128_v5  ;;  %1149 = vmatpush.bf16.msra.mxu1 %v1128_v5 }
  0x22   : > { %1150 = vmatpush.bf16.msra.mxu2 %v1128_v5  ;;  %1151 = vmatpush.bf16.msra.mxu3 %v1128_v5 }
  0x25   : > { %533 = vmatpush.bf16.msra.mxu0 %v1127_v6  ;;  %1152 = vmatpush.bf16.msra.mxu1 %v1127_v6 }
  0x26   : > { %1153 = vmatpush.bf16.msra.mxu2 %v1127_v6  ;;  %1154 = vmatpush.bf16.msra.mxu3 %v1127_v6 }
  0x29   : > { %534 = vmatpush.bf16.msra.mxu0 %v1126_v7  ;;  %1155 = vmatpush.bf16.msra.mxu1 %v1126_v7 }
  0x2a   : > { %1156 = vmatpush.bf16.msra.mxu2 %v1126_v7  ;;  %1157 = vmatpush.bf16.msra.mxu3 %v1126_v7 }
  0x2c   : > { %535 = vmatmul.bf16.vlgmr.msra.gmra.mxu0 %v1110_v8  ;;  %555 = vmatmul.bf16.vlgmr.msra.gmra.mxu1 %v1114_v9 }
  0x2d   : > { %575 = vmatmul.bf16.vlgmr.msra.gmra.mxu2 %v1118_v10  ;;  %595 = vmatmul.bf16.vlgmr.msra.gmra.mxu3 %v1122_v11 }
  0x3c   : > { %540 = vmatmul.bf16.gmra.mxu0 %v1111_v12  ;;  %560 = vmatmul.bf16.gmra.mxu1 %v1115_v13 }
  0x3d   : > { %580 = vmatmul.bf16.gmra.mxu2 %v1119_v14  ;;  %600 = vmatmul.bf16.gmra.mxu3 %v1123_v15 }
  0x4c   : > { %545 = vmatmul.bf16.gmra.mxu0 %v1112_v16  ;;  %565 = vmatmul.bf16.gmra.mxu1 %v1116_v17 }
  0x4d   : > { %585 = vmatmul.bf16.gmra.mxu2 %v1120_v18  ;;  %605 = vmatmul.bf16.gmra.mxu3 %v1124_v19 }
  0x5c   : > { %550 = vmatmul.bf16.gmra.mxu0 %v1113_v20  ;;  %570 = vmatmul.bf16.gmra.mxu1 %v1117_v21 }
  0x5d   : > { %590 = vmatmul.bf16.gmra.mxu2 %v1121_v22  ;;  %610 = vmatmul.bf16.gmra.mxu3 %v1125_v23 }
  0xa9   : > { %v536_v24 = vpop.f32.mrf.mxu0  ;;  %v1306_v25 = vpop.f32.mrf.mxu1 }
  0xaa   : > { %715 = vst [vmem:[%s1304_s21] sm:$0xff] %v536_v24  ;;  %v784_v47 = vmul.f32 %v536_v24, %v536_v24  ;;  %v792_v11 = vmul.f32 %v1306_v25, %v1306_v25 }
  0xab   : > { %723 = vst [vmem:[%s1304_s21 + $0x40] sm:$0xff] %v1306_v25 }
  0xb0   : > { %v1311_v26 = vpop.f32.mrf.mxu2  ;;  %v1318_v29 = vpop.f32.mrf.mxu3 }
  0xb1   : > { %v538_v27 = vpop.f32.mrf.mxu0  ;;  %v1313_v28 = vpop.f32.mrf.mxu1  ;;  %731 = vst [vmem:[%s1304_s21 + $0x80] sm:$0xff] %v1311_v26 }
  0xb2   : > { %716 = vst [vmem:[%s1304_s21 + $0x8] sm:$0xff] %v538_v27  ;;  %v785_v46 = vmul.f32 %v538_v27, %v538_v27  ;;  %v747_v48 = vadd.f32 %v538_v27, %v536_v24  ;;  %v793_v14 = vmul.f32 %v1313_v28, %v1313_v28 }
  0xb3   : > { %724 = vst [vmem:[%s1304_s21 + $0x48] sm:$0xff] %v1313_v28 }
  0xb4   : > { %739 = vst [vmem:[%s1304_s21 + $0xc0] sm:$0xff] %v1318_v29  ;;  %v816_v50 = vadd.f32 %v785_v46, %v784_v47 }
  0xb8   : > { %v1324_v30 = vpop.f32.mrf.mxu2  ;;  %v1331_v33 = vpop.f32.mrf.mxu3 }
  0xb9   : > { %v541_v31 = vpop.f32.mrf.mxu0  ;;  %v1326_v32 = vpop.f32.mrf.mxu1  ;;  %732 = vst [vmem:[%s1304_s21 + $0x88] sm:$0xff] %v1324_v30 }
  0xba   : > { %717 = vst [vmem:[%s1304_s21 + $0x10] sm:$0xff] %v541_v31  ;;  %v786_v49 = vmul.f32 %v541_v31, %v541_v31  ;;  %v748_v51 = vadd.f32 %v747_v48, %v541_v31  ;;  %v794_v17 = vmul.f32 %v1326_v32, %v1326_v32 }
  0xbb   : > { %725 = vst [vmem:[%s1304_s21 + $0x50] sm:$0xff] %v1326_v32 }
  0xbc   : > { %740 = vst [vmem:[%s1304_s21 + $0xc8] sm:$0xff] %v1331_v33  ;;  %v817_v56 = vadd.f32 %v816_v50, %v786_v49  ;;  %v800_v49 = vmul.f32 %v1311_v26, %v1311_v26 }
  0xc0   : > { %v1337_v34 = vpop.f32.mrf.mxu2  ;;  %v1344_v37 = vpop.f32.mrf.mxu3 }
  0xc1   : > { %v543_v35 = vpop.f32.mrf.mxu0  ;;  %v1339_v36 = vpop.f32.mrf.mxu1  ;;  %733 = vst [vmem:[%s1304_s21 + $0x90] sm:$0xff] %v1337_v34 }
  0xc2   : > { %718 = vst [vmem:[%s1304_s21 + $0x18] sm:$0xff] %v543_v35  ;;  %v787_v52 = vmul.f32 %v543_v35, %v543_v35  ;;  %v749_v57 = vadd.f32 %v748_v51, %v543_v35  ;;  %v795_v21 = vmul.f32 %v1339_v36, %v1339_v36 }
  0xc3   : > { %726 = vst [vmem:[%s1304_s21 + $0x58] sm:$0xff] %v1339_v36 }
  0xc4   : > { %741 = vst [vmem:[%s1304_s21 + $0xd0] sm:$0xff] %v1344_v37  ;;  %v818_v60 = vadd.f32 %v817_v56, %v787_v52 }
  0xc8   : > { %v1350_v38 = vpop.f32.mrf.mxu2  ;;  %v1357_v41 = vpop.f32.mrf.mxu3 }
  0xc9   : > { %v546_v39 = vpop.f32.mrf.mxu0  ;;  %v1352_v40 = vpop.f32.mrf.mxu1  ;;  %734 = vst [vmem:[%s1304_s21 + $0x98] sm:$0xff] %v1350_v38 }
  0xca   : > { %719 = vst [vmem:[%s1304_s21 + $0x20] sm:$0xff] %v546_v39  ;;  %v788_v58 = vmul.f32 %v546_v39, %v546_v39  ;;  %v750_v61 = vadd.f32 %v749_v57, %v546_v39  ;;  %v803_v57 = vmul.f32 %v1350_v38, %v1350_v38 }
  0xcb   : > { %727 = vst [vmem:[%s1304_s21 + $0x60] sm:$0xff] %v1352_v40 }
  0xcc   : > { %742 = vst [vmem:[%s1304_s21 + $0xd8] sm:$0xff] %v1357_v41  ;;  %v819_v63 = vadd.f32 %v818_v60, %v788_v58 }
  0xd0   : > { %v1363_v42 = vpop.f32.mrf.mxu2  ;;  %v1370_v45 = vpop.f32.mrf.mxu3 }
  0xd1   : > { %v548_v43 = vpop.f32.mrf.mxu0  ;;  %v1365_v44 = vpop.f32.mrf.mxu1  ;;  %735 = vst [vmem:[%s1304_s21 + $0xa0] sm:$0xff] %v1363_v42 }
  0xd2   : > { %720 = vst [vmem:[%s1304_s21 + $0x28] sm:$0xff] %v548_v43  ;;  %v789_v62 = vmul.f32 %v548_v43, %v548_v43  ;;  %v751_v0 = vadd.f32 %v750_v61, %v548_v43  ;;  %v797_v31 = vmul.f32 %v1365_v44, %v1365_v44 }
  0xd3   : > { %728 = vst [vmem:[%s1304_s21 + $0x68] sm:$0xff] %v1365_v44 }
  0xd4   : > { %743 = vst [vmem:[%s1304_s21 + $0xe0] sm:$0xff] %v1370_v45  ;;  %v820_v2 = vadd.f32 %v819_v63, %v789_v62 }
  0xd8   : > { %v1376_v53 = vpop.f32.mrf.mxu2  ;;  %v1381_v59 = vpop.f32.mrf.mxu3 }
  0xd9   : > { %v551_v54 = vpop.f32.mrf.mxu0  ;;  %v571_v55 = vpop.f32.mrf.mxu1  ;;  %736 = vst [vmem:[%s1304_s21 + $0xa8] sm:$0xff] %v1376_v53  ;;  %v805_v63 = vmul.f32 %v1376_v53, %v1376_v53 }
  0xda   : > { %721 = vst [vmem:[%s1304_s21 + $0x30] sm:$0xff] %v551_v54  ;;  %v790_v1 = vmul.f32 %v551_v54, %v551_v54  ;;  %v752_v3 = vadd.f32 %v751_v0, %v551_v54  ;;  %v798_v43 = vmul.f32 %v571_v55, %v571_v55 }
  0xdb   : > { %729 = vst [vmem:[%s1304_s21 + $0x70] sm:$0xff] %v571_v55 }
  0xdc   : > { %744 = vst [vmem:[%s1304_s21 + $0xe8] sm:$0xff] %v1381_v59  ;;  %v821_v7 = vadd.f32 %v820_v2, %v790_v1 }
  0xe0   : > { %v591_v4 = vpop.f32.mrf.mxu2  ;;  %v1388_v10 = vpop.f32.mrf.mxu3 }
  0xe1   : > { %v553_v5 = vpop.f32.mrf.mxu0  ;;  %v573_v6 = vpop.f32.mrf.mxu1  ;;  %737 = vst [vmem:[%s1304_s21 + $0xb0] sm:$0xff] %v591_v4  ;;  %v806_v2 = vmul.f32 %v591_v4, %v591_v4 }
  0xe2   : > { %722 = vst [vmem:[%s1304_s21 + $0x38] sm:$0xff] %v553_v5  ;;  %v753_v8 = vadd.f32 %v752_v3, %v553_v5  ;;  %v791_v9 = vmul.f32 %v553_v5, %v553_v5 }
  0xe3   : > { %730 = vst [vmem:[%s1304_s21 + $0x78] sm:$0xff] %v573_v6 }
  0xe4   : > { %v754_v12 = vadd.f32 %v753_v8, %v1306_v25  ;;  %v822_v13 = vadd.f32 %v821_v7, %v791_v9  ;;  %745 = vst [vmem:[%s1304_s21 + $0xf0] sm:$0xff] %v1388_v10  ;;  %v796_v25 = vmul.f32 %v1352_v40, %v1352_v40 }
  0xe6   : > { %v755_v15 = vadd.f32 %v754_v12, %v1313_v28  ;;  %v823_v16 = vadd.f32 %v822_v13, %v792_v11  ;;  %v811_v13 = vmul.f32 %v1357_v41, %v1357_v41 }
  0xe8   : > { %v756_v18 = vadd.f32 %v755_v15, %v1326_v32  ;;  %v824_v19 = vadd.f32 %v823_v16, %v793_v14  ;;  %v593_v20 = vpop.f32.mrf.mxu2  ;;  %v613_v24 = vpop.f32.mrf.mxu3  ;;  %v812_v15 = vmul.f32 %v1370_v45, %v1370_v45 }
  0xe9   : > { %738 = vst [vmem:[%s1304_s21 + $0xb8] sm:$0xff] %v593_v20 }
  0xea   : > { %v825_v22 = vadd.f32 %v824_v19, %v794_v17  ;;  %v757_v23 = vadd.f32 %v756_v18, %v1339_v36  ;;  %746 = vst [vmem:[%s1304_s21 + $0xf8] sm:$0xff] %v613_v24  ;;  %v799_v36 = vmul.f32 %v573_v6, %v573_v6  ;;  %v813_v18 = vmul.f32 %v1381_v59, %v1381_v59 }
  0xec   : > { %v758_v27 = vadd.f32 %v757_v23, %v1352_v40  ;;  %v826_v28 = vadd.f32 %v825_v22, %v795_v21  ;;  %v801_v40 = vmul.f32 %v1324_v30, %v1324_v30  ;;  %v814_v21 = vmul.f32 %v1388_v10, %v1388_v10 }
  0xed   : > { %v815_v23 = vmul.f32 %v613_v24, %v613_v24 }
  0xee   : > { %v759_v32 = vadd.f32 %v758_v27, %v1365_v44  ;;  %v827_v35 = vadd.f32 %v826_v28, %v796_v25  ;;  %v802_v44 = vmul.f32 %v1337_v34, %v1337_v34 }
  0xf0   : > { %v760_v39 = vadd.f32 %v759_v32, %v571_v55  ;;  %v828_v46 = vadd.f32 %v827_v35, %v797_v31 }
  0xf2   : > { %v829_v47 = vadd.f32 %v828_v46, %v798_v43  ;;  %v761_v48 = vadd.f32 %v760_v39, %v573_v6  ;;  %v807_v6 = vmul.f32 %v593_v20, %v593_v20 }
  0xf4   : > { %v762_v50 = vadd.f32 %v761_v48, %v1311_v26  ;;  %v830_v51 = vadd.f32 %v829_v47, %v799_v36  ;;  %v804_v26 = vmul.f32 %v1363_v42, %v1363_v42 }
  0xf6   : > { %v763_v52 = vadd.f32 %v762_v50, %v1324_v30  ;;  %v831_v54 = vadd.f32 %v830_v51, %v800_v49 }
  0xf8   : > { %v764_v55 = vadd.f32 %v763_v52, %v1337_v34  ;;  %v832_v56 = vadd.f32 %v831_v54, %v801_v40 }
  0xfa   : > { %v833_v58 = vadd.f32 %v832_v56, %v802_v44  ;;  %v765_v60 = vadd.f32 %v764_v55, %v1350_v38  ;;  %v808_v38 = vmul.f32 %v1318_v29, %v1318_v29 }
  0xfc   : > { %v766_v61 = vadd.f32 %v765_v60, %v1363_v42  ;;  %v834_v62 = vadd.f32 %v833_v58, %v803_v57  ;;  %v809_v42 = vmul.f32 %v1331_v33, %v1331_v33 }
  0xfe   : > { %v767_v30 = vadd.f32 %v766_v61, %v1376_v53  ;;  %v835_v0 = vadd.f32 %v834_v62, %v804_v26  ;;  %v810_v53 = vmul.f32 %v1344_v37, %v1344_v37 }
 0x100   : > { %v836_v34 = vadd.f32 %v835_v0, %v805_v63  ;;  %v768_v1 = vadd.f32 %v767_v30, %v591_v4 }
 0x102   : > { %v837_v3 = vadd.f32 %v836_v34, %v806_v2  ;;  %v769_v5 = vadd.f32 %v768_v1, %v593_v20 }
 0x104   : > { %v770_v7 = vadd.f32 %v769_v5, %v1318_v29  ;;  %v838_v8 = vadd.f32 %v837_v3, %v807_v6 }
 0x106   : > { %v771_v9 = vadd.f32 %v770_v7, %v1331_v33  ;;  %v839_v11 = vadd.f32 %v838_v8, %v808_v38 }
 0x108   : > { %v772_v4 = vadd.f32 %v771_v9, %v1344_v37  ;;  %v840_v12 = vadd.f32 %v839_v11, %v809_v42 }
 0x10a   : > { %v841_v14 = vadd.f32 %v840_v12, %v810_v53  ;;  %v773_v29 = vadd.f32 %v772_v4, %v1357_v41 }
 0x10c   : > { %v774_v33 = vadd.f32 %v773_v29, %v1370_v45  ;;  %v842_v16 = vadd.f32 %v841_v14, %v811_v13 }
 0x10e   : > { %v775_v17 = vadd.f32 %v774_v33, %v1381_v59  ;;  %v843_v37 = vadd.f32 %v842_v16, %v812_v15 }
 0x110   : > { %v844_v19 = vadd.f32 %v843_v37, %v813_v18  ;;  %v776_v20 = vadd.f32 %v775_v17, %v1388_v10 }
 0x112   : > { %v845_v41 = vadd.f32 %v844_v19, %v814_v21  ;;  %v777_v22 = vadd.f32 %v776_v20, %v613_v24 }
 0x114   : > { %v778_v25 = vrot.slane %v777_v22, 4  ;;  %v846_v27 = vadd.f32 %v845_v41, %v815_v23 }
 0x116   : > { %v779_v45 = vadd.f32 %v778_v25, %v777_v22  ;;  %v847_v28 = vrot.slane %v846_v27, 4 }
 0x118   : > { %v780_v31 = vrot.slane %v779_v45, 2  ;;  %v848_v32 = vadd.f32 %v847_v28, %v846_v27 }
 0x11a   : > { %v781_v59 = vadd.f32 %v780_v31, %v779_v45  ;;  %v849_v35 = vrot.slane %v848_v32, 2 }
 0x11c   : > { %v782_v39 = vrot.slane %v781_v59, 1  ;;  %v850_v43 = vadd.f32 %v849_v35, %v848_v32 }
 0x11e   : > { %v783_v10 = vadd.f32 %v782_v39, %v781_v59  ;;  %v851_v46 = vrot.slane %v850_v43, 1 }
 0x120   : > { %v852_v24 = vadd.f32 %v851_v46, %v850_v43  ;;  %853 = vst [vmem:[%s262_s25] sm:$0xff] %v783_v10 }
 0x122   : > { %854 = vst [vmem:[%s266_s28] sm:$0xff] %v852_v24 }
 0x123 PF: > { %s15_s17 = sadd.s32 1, %s1204_s17   ;;  %s1474_s15 = smov %s1200_s16 }
 0x124   : > { %p12_p6 = scmp.ge.s32.totalorder %s15_s17, 4   ;;  %s1475_s16 = smov %s1477_s18 }
 0x126   :  { %14 = sbr.rel (!%p12_p6) target bundleno = 2 (0x2), region = 93 }

</bundles_post_ra>
